<compile_context>
chip_gen: v7x
topology: tpu7x:2x2x1
jax: 0.10.0
libtpu: 0.0.40
codegen_flags: <defaults>
</compile_context>

<pallas_src>
import math

import jax
import jax.numpy as jnp
from jax import lax
from jax.experimental import pallas as pl
from jax.experimental.pallas import tpu as pltpu

# pair indices: 0 = coarse, 1..3 = medium1..3, 4..6 = fine1..3
PAIRS = ((0, 1), (0, 2), (0, 3),
         (1, 4), (1, 5), (1, 6),
         (2, 4), (2, 5), (2, 6),
         (3, 4), (3, 5), (3, 6))


# ------------------------- fused Pallas kernel -------------------------

def _make_contrast_kernel(inv_tau, inv_n):
    dn_t = (((1,), (1,)), ((), ()))  # A @ B^T: contract last dims of both operands (MXU)

    def kernel(x_ref, w1_ref, b1_ref, w2_ref, b2_ref,
               pos_ref, sel_ref, wgt_ref, o_ref):
        # --- projection MLP on all V*N rows at once: Linear -> ELU -> Linear ---
        x = x_ref[...]                                                        # (VN, H)
        h = jnp.dot(x, w1_ref[...], preferred_element_type=jnp.float32) + b1_ref[...]
        # ELU(alpha=1); clamp the exp argument so the unselected branch never overflows.
        h = jnp.where(h > 0.0, h, jnp.exp(jnp.minimum(h, 0.0)) - 1.0)
        z = jnp.dot(h, w2_ref[...], preferred_element_type=jnp.float32) + b2_ref[...]

        # --- cosine similarity of every row pair via ONE Gram matmul.
        #     1/tau is folded into the left operand's row normalization (rsqrt, no divides).
        inv_norm = lax.rsqrt(jnp.sum(z * z, axis=-1, keepdims=True))          # (VN, 1)
        zl = z * (inv_norm * inv_tau)
        zr = z * inv_norm
        e = jnp.exp(lax.dot_general(zl, zr, dn_t,
                                    preferred_element_type=jnp.float32))      # (VN, VN) = exp(cos/tau)

        # --- per-(row, column-block) softmax numerator/denominator via block-sum matmuls.
        #     sel is a (VN, V) column-block indicator, so E @ sel gives every block's row sums;
        #     E is symmetric, so the "transposed" direction of a pair is just another block.
        num = jnp.dot(e * pos_ref[...], sel_ref[...],
                      preferred_element_type=jnp.float32)                     # (VN, V)
        den = jnp.dot(e, sel_ref[...],
                      preferred_element_type=jnp.float32) + 1e-8              # (VN, V)

        # -log(sum(p * pos)) == log(den) - log(num). Weight by lam/(1-lam) per used block and
        # sum; mask unused (e.g. diagonal) blocks so a zero numerator there can't give 0 * inf.
        w = wgt_ref[...]                                                      # (VN, V)
        num = jnp.where(w > 0.0, num, 1.0)
        o_ref[0, 0] = jnp.sum((jnp.log(den) - jnp.log(num)) * w) * inv_n

    return kernel


# ------------------------- wrapper -------------------------

def contrast_forward(views, pos, params, tau, lam):
    """views: list of V arrays (N, H); pos: (N, N); returns scalar loss."""
    w1, b1, w2, b2 = params
    v = len(views)
    n, _ = views[0].shape
    x = jnp.concatenate([jnp.asarray(vw, jnp.float32) for vw in views], axis=0)   # (V*N, H)

    # Tiny host-side constants consumed by the fused kernel.
    pos_f = jnp.asarray(pos, jnp.float32)
    pos_t = jnp.tile(pos_f, (v, v))                                                # (V*N, V*N)
    sel = jnp.kron(jnp.eye(v, dtype=jnp.float32), jnp.ones((n, 1), jnp.float32))   # (V*N, V)
    wm = [[0.0] * v for _ in range(v)]
    for a, b in PAIRS:
        wm[a][b] += lam          # lam-weighted direction uses block (a, b)
        wm[b][a] += 1.0 - lam    # (1-lam)-weighted direction uses block (b, a) (= transpose)
    wgt = jnp.repeat(jnp.asarray(wm, jnp.float32), n, axis=0)                      # (V*N, V)

    loss = pl.pallas_call(
        _make_contrast_kernel(1.0 / tau, 1.0 / float(n)),
        out_shape=jax.ShapeDtypeStruct((1, 1), jnp.float32),
        out_specs=pl.BlockSpec(memory_space=pltpu.MemorySpace.SMEM),
    )(x,
      jnp.asarray(w1, jnp.float32), jnp.asarray(b1, jnp.float32),
      jnp.asarray(w2, jnp.float32), jnp.asarray(b2, jnp.float32),
      pos_t, sel, wgt)
    return loss[0, 0]


# ------------------------- pure-JAX reference (mirrors the torch code) -------------------------

def reference_loss(views, pos, params, tau, lam):
    w1, b1, w2, b2 = params

    def proj(x):
        hh = x @ w1 + b1
        hh = jnp.where(hh > 0.0, hh, jnp.exp(hh) - 1.0)
        return hh @ w2 + b2

    def sim(z1, z2):
        n1 = jnp.linalg.norm(z1, axis=-1, keepdims=True)
        n2 = jnp.linalg.norm(z2, axis=-1, keepdims=True)
        return jnp.exp((z1 @ z2.T) / (n1 @ n2.T) / tau)

    zs = [proj(v) for v in views]
    loss = 0.0
    for a, b in PAIRS:
        s = sim(zs[a], zs[b])
        st = s.T
        s = s / (jnp.sum(s, axis=1, keepdims=True) + 1e-8)
        st = st / (jnp.sum(st, axis=1, keepdims=True) + 1e-8)
        loss += -jnp.mean(jnp.log(jnp.sum(s * pos, axis=-1))) * lam
        loss += -jnp.mean(jnp.log(jnp.sum(st * pos, axis=-1))) * (1.0 - lam)
    return loss


# ------------------------- main -------------------------

if __name__ == "__main__":
    N, H = 8, 32
    tau, lam = 0.8, 0.5

    key = jax.random.PRNGKey(0)
    keys = jax.random.split(key, 16)

    # Deterministic parameter init (xavier_normal_ with gain=1.414 for weights,
    # PyTorch-default uniform(-1/sqrt(fan_in), 1/sqrt(fan_in)) for biases).
    gain = 1.414
    std = gain * math.sqrt(2.0 / (H + H))
    bound = 1.0 / math.sqrt(H)
    w1 = (std * jax.random.normal(keys[0], (H, H))).astype(jnp.float32)   # (in, out) = torch weight.T
    b1 = (jax.random.uniform(keys[1], (1, H), minval=-bound, maxval=bound)).astype(jnp.float32)
    w2 = (std * jax.random.normal(keys[2], (H, H))).astype(jnp.float32)
    b2 = (jax.random.uniform(keys[3], (1, H), minval=-bound, maxval=bound)).astype(jnp.float32)
    params = (w1, b1, w2, b2)

    # 7 input views: coarse, medium1-3, fine1-3, each (N, H); pos is (N, N) binary with self-positives.
    views = [jax.random.normal(keys[4 + i], (N, H), dtype=jnp.float32) for i in range(7)]
    pos = ((jax.random.uniform(keys[12], (N, N)) < 0.25) | jnp.eye(N, dtype=bool)).astype(jnp.float32)

    loss = jax.block_until_ready(contrast_forward(views, pos, params, tau, lam))
    ref = jax.block_until_ready(reference_loss(views, pos, params, tau, lam))

    assert jnp.isfinite(loss), "non-finite loss from Pallas kernel"
    assert jnp.allclose(loss, ref, rtol=1e-3, atol=1e-4), (loss, ref)
    print("KERNEL_OK")
</pallas_src>

<mosaic_0001>
module attributes {stable_mosaic.version = 11 : i64} {
  func.func @kernel(%arg0: memref<56x32xf32, #tpu.memory_space<vmem>>, %arg1: memref<32x32xf32, #tpu.memory_space<vmem>>, %arg2: memref<1x32xf32, #tpu.memory_space<vmem>>, %arg3: memref<32x32xf32, #tpu.memory_space<vmem>>, %arg4: memref<1x32xf32, #tpu.memory_space<vmem>>, %arg5: memref<56x56xf32, #tpu.memory_space<vmem>>, %arg6: memref<56x7xf32, #tpu.memory_space<vmem>>, %arg7: memref<56x7xf32, #tpu.memory_space<vmem>>, %arg8: memref<1x1xf32, #tpu.memory_space<smem>>) attributes {dimension_semantics = [], scalar_prefetch = 0 : i64, scratch_operands = 0 : i64, tpu.core_type = #tpu.core_type<tc>} {
    %c0 = arith.constant 0 : index
    %c0_0 = arith.constant 0 : index
    %0 = vector.load %arg0[%c0, %c0_0] : memref<56x32xf32, #tpu.memory_space<vmem>>, vector<56x32xf32>
    %c0_1 = arith.constant 0 : index
    %c0_2 = arith.constant 0 : index
    %1 = vector.load %arg1[%c0_1, %c0_2] : memref<32x32xf32, #tpu.memory_space<vmem>>, vector<32x32xf32>
    %cst = arith.constant dense<0.000000e+00> : vector<56x32xf32>
    %2 = tpu.matmul %0, %1, %cst {dimension_numbers = #tpu.dot_dimension_numbers<[1], [0], [0], [1], [0, 0, 1, 1], [], []>} : vector<56x32xf32>, vector<32x32xf32>, vector<56x32xf32> -> vector<56x32xf32>
    %c0_3 = arith.constant 0 : index
    %c0_4 = arith.constant 0 : index
    %3 = vector.load %arg2[%c0_3, %c0_4] : memref<1x32xf32, #tpu.memory_space<vmem>>, vector<1x32xf32>
    %4 = vector.broadcast %3 : vector<1x32xf32> to vector<56x32xf32>
    %5 = arith.addf %2, %4 : vector<56x32xf32>
    %cst_5 = arith.constant 0.000000e+00 : f32
    %6 = vector.broadcast %cst_5 : f32 to vector<56x32xf32>
    %7 = arith.cmpf ogt, %5, %6 : vector<56x32xf32>
    %cst_6 = arith.constant 0.000000e+00 : f32
    %8 = vector.broadcast %cst_6 : f32 to vector<56x32xf32>
    %9 = arith.minimumf %5, %8 : vector<56x32xf32>
    %10 = math.exp %9 : vector<56x32xf32>
    %cst_7 = arith.constant 1.000000e+00 : f32
    %11 = vector.broadcast %cst_7 : f32 to vector<56x32xf32>
    %12 = arith.subf %10, %11 : vector<56x32xf32>
    %13 = arith.select %7, %5, %12 : vector<56x32xi1>, vector<56x32xf32>
    %c0_8 = arith.constant 0 : index
    %c0_9 = arith.constant 0 : index
    %14 = vector.load %arg3[%c0_8, %c0_9] : memref<32x32xf32, #tpu.memory_space<vmem>>, vector<32x32xf32>
    %cst_10 = arith.constant dense<0.000000e+00> : vector<56x32xf32>
    %15 = tpu.matmul %13, %14, %cst_10 {dimension_numbers = #tpu.dot_dimension_numbers<[1], [0], [0], [1], [0, 0, 1, 1], [], []>} : vector<56x32xf32>, vector<32x32xf32>, vector<56x32xf32> -> vector<56x32xf32>
    %c0_11 = arith.constant 0 : index
    %c0_12 = arith.constant 0 : index
    %16 = vector.load %arg4[%c0_11, %c0_12] : memref<1x32xf32, #tpu.memory_space<vmem>>, vector<1x32xf32>
    %17 = vector.broadcast %16 : vector<1x32xf32> to vector<56x32xf32>
    %18 = arith.addf %15, %17 : vector<56x32xf32>
    %19 = arith.mulf %18, %18 : vector<56x32xf32>
    %cst_13 = arith.constant dense<0.000000e+00> : vector<56xf32>
    %20 = vector.multi_reduction <add>, %19, %cst_13 [1] : vector<56x32xf32> to vector<56xf32>
    %21 = vector.shape_cast %20 : vector<56xf32> to vector<56x1xf32>
    %22 = math.rsqrt %21 : vector<56x1xf32>
    %cst_14 = arith.constant 1.250000e+00 : f32
    %23 = vector.broadcast %cst_14 : f32 to vector<56x1xf32>
    %24 = arith.mulf %22, %23 : vector<56x1xf32>
    %25 = vector.broadcast %24 : vector<56x1xf32> to vector<56x32xf32>
    %26 = arith.mulf %18, %25 : vector<56x32xf32>
    %27 = vector.broadcast %22 : vector<56x1xf32> to vector<56x32xf32>
    %28 = arith.mulf %18, %27 : vector<56x32xf32>
    %cst_15 = arith.constant dense<0.000000e+00> : vector<56x56xf32>
    %29 = tpu.matmul %26, %28, %cst_15 {dimension_numbers = #tpu.dot_dimension_numbers<[1], [1], [0], [0], [0, 0, 1, 0], [], []>} : vector<56x32xf32>, vector<56x32xf32>, vector<56x56xf32> -> vector<56x56xf32>
    %30 = math.exp %29 : vector<56x56xf32>
    %c0_16 = arith.constant 0 : index
    %c0_17 = arith.constant 0 : index
    %31 = vector.load %arg5[%c0_16, %c0_17] : memref<56x56xf32, #tpu.memory_space<vmem>>, vector<56x56xf32>
    %32 = arith.mulf %30, %31 : vector<56x56xf32>
    %c0_18 = arith.constant 0 : index
    %c0_19 = arith.constant 0 : index
    %33 = vector.load %arg6[%c0_18, %c0_19] : memref<56x7xf32, #tpu.memory_space<vmem>>, vector<56x7xf32>
    %cst_20 = arith.constant dense<0.000000e+00> : vector<56x7xf32>
    %34 = tpu.matmul %32, %33, %cst_20 {dimension_numbers = #tpu.dot_dimension_numbers<[1], [0], [0], [1], [0, 0, 1, 1], [], []>} : vector<56x56xf32>, vector<56x7xf32>, vector<56x7xf32> -> vector<56x7xf32>
    %c0_21 = arith.constant 0 : index
    %c0_22 = arith.constant 0 : index
    %35 = vector.load %arg6[%c0_21, %c0_22] : memref<56x7xf32, #tpu.memory_space<vmem>>, vector<56x7xf32>
    %cst_23 = arith.constant dense<0.000000e+00> : vector<56x7xf32>
    %36 = tpu.matmul %30, %35, %cst_23 {dimension_numbers = #tpu.dot_dimension_numbers<[1], [0], [0], [1], [0, 0, 1, 1], [], []>} : vector<56x56xf32>, vector<56x7xf32>, vector<56x7xf32> -> vector<56x7xf32>
    %cst_24 = arith.constant 9.99999993E-9 : f32
    %37 = vector.broadcast %cst_24 : f32 to vector<56x7xf32>
    %38 = arith.addf %36, %37 : vector<56x7xf32>
    %c0_25 = arith.constant 0 : index
    %c0_26 = arith.constant 0 : index
    %39 = vector.load %arg7[%c0_25, %c0_26] : memref<56x7xf32, #tpu.memory_space<vmem>>, vector<56x7xf32>
    %cst_27 = arith.constant 0.000000e+00 : f32
    %40 = vector.broadcast %cst_27 : f32 to vector<56x7xf32>
    %41 = arith.cmpf ogt, %39, %40 : vector<56x7xf32>
    %cst_28 = arith.constant 1.000000e+00 : f32
    %42 = vector.broadcast %cst_28 : f32 to vector<56x7xf32>
    %43 = arith.select %41, %34, %42 : vector<56x7xi1>, vector<56x7xf32>
    %44 = math.log %38 : vector<56x7xf32>
    %45 = math.log %43 : vector<56x7xf32>
    %46 = arith.subf %44, %45 : vector<56x7xf32>
    %47 = arith.mulf %46, %39 : vector<56x7xf32>
    %48 = vector.shape_cast %47 : vector<56x7xf32> to vector<1x56x7xf32>
    %cst_29 = arith.constant dense<0.000000e+00> : vector<1xf32>
    %49 = vector.multi_reduction <add>, %48, %cst_29 [1, 2] : vector<1x56x7xf32> to vector<1xf32>
    %50 = vector.shape_cast %49 : vector<1xf32> to vector<1x1x1xf32>
    %51 = vector.extract %50[0, 0, 0] : f32 from vector<1x1x1xf32>
    %cst_30 = arith.constant 1.250000e-01 : f32
    %52 = arith.mulf %51, %cst_30 : f32
    %c0_31 = arith.constant 0 : index
    %c0_32 = arith.constant 0 : index
    %53 = memref.load %arg8[%c0_31, %c0_32] : memref<1x1xf32, #tpu.memory_space<smem>>
    memref.store %52, %arg8[%c0_31, %c0_32] : memref<1x1xf32, #tpu.memory_space<smem>>
    return
  }
}

</mosaic_0001>

<bundles_post_ra>
// kernel: tpu_custom_call.1
= control target key start
LH: loop header
LB: loop body
LE: loop exit
PB: predicated region body
PF: predicated region fallthrough
CT: control target
= control target key end

     0   :  { %v1338_v3 = vmov 0.0|0.0   ;;  %vm1339_vm0 = vmmov 0   ;;  %v1340_v6 = vmov 0.0   ;;  %s1738_s0 = inlined_call_operand.vmem [shape: f32[56,32], index: 0, kind: input, shape index: {}]   ;;  %s1739_s1 = inlined_call_operand.vmem [shape: f32[32,32], index: 1, kind: input, shape index: {}]   ;;  %s1740_s2 = inlined_call_operand.vmem [shape: f32[1,32], index: 2, kind: input, shape index: {}]   ;;  %s1741_s3 = inlined_call_operand.vmem [shape: f32[32,32], index: 3, kind: input, shape index: {}]   ;;  %s1742_s4 = inlined_call_operand.vmem [shape: f32[1,32], index: 4, kind: input, shape index: {}]   ;;  %s1743_s5 = inlined_call_operand.vmem [shape: f32[56,56], index: 5, kind: input, shape index: {}]   ;;  %s1744_s6 = inlined_call_operand.vmem [shape: f32[56,7], index: 6, kind: input, shape index: {}]   ;;  %s1745_s7 = inlined_call_operand.vmem [shape: f32[56,7], index: 7, kind: input, shape index: {}]   ;;  %s1746_s8 = inlined_call_operand.hbm [shape: f32[1,1], index: 8, kind: output, shape index: {}]  }
   0x1   :  { %v37_v0 = vld [vmem:[%s1739_s1] sm:$0xff]  ;;  %v38_v1 = vld [vmem:[%s1739_s1 + $0x8] sm:$0xff]  ;;  %v39_v2 = vld [vmem:[%s1739_s1 + $0x10] sm:$0xff]  ;;  %1200 = vmatprep.subr.bf16.mxu0 %v1338_v3  ;;  %1045 = vmatprep.mubr.msk.f32.mxu0 %vm1339_vm0, %v1340_v6 }
   0x2   :  { %v1201_v4 = vpack.c.bf16 %v38_v1, %v37_v0  ;;  %v40_v5 = vld [vmem:[%s1739_s1 + $0x18] sm:$0xff]  ;;  %1206 = vmatprep.subr.bf16.mxu1 %v1338_v3  ;;  %1074 = vmatprep.mubr.msk.f32.mxu1 %vm1339_vm0, %v1340_v6 }
   0x3   :  { %v1204_v7 = vpack.c.bf16 %v40_v5, %v39_v2 }
   0x4   :  { %1202 = vmatpush3.bf16.msra.mxu0 %v1201_v4 }
   0x5   :  { %1203 = vmatprep.subr.bf16.mxu0 %v1338_v3 }
   0x6   :  { %13 = vsyncpa [#allocation3], 0  ;;  %v30_v8 = vld [vmem:[%s1738_s0] sm:$0xff]  ;;  %vm48_vm1 = vcmask 261120   ;;  %v31_v9 = vld [vmem:[%s1738_s0 + $0x8] sm:$0xff]  ;;  %vm577_vm10 = vcmask 457728  }
   0x7   :  { %v32_v10 = vld [vmem:[%s1738_s0 + $0x10] sm:$0xff]  ;;  %v33_v11 = vld [vmem:[%s1738_s0 + $0x18] sm:$0xff]  ;;  %v34_v12 = vld [vmem:[%s1738_s0 + $0x20] sm:$0xff]  ;;  %s1326_s26 = scalar_lea.hbm %s1746_s8, 16 }
   0x8   :  { %1205 = vmatpush3.bf16.msra.mxu0 %v1204_v7  ;;  %v35_v13 = vld [vmem:[%s1738_s0 + $0x28] sm:$0xff]  ;;  %v36_v14 = vld [vmem:[%s1738_s0 + $0x30] sm:$0xff]  ;;  %v212_v15 = vld [vmem:[%s1741_s3] sm:$0xff]  ;;  %p1327_p0 = scmp.ne.s32.totalorder %s1746_s8, %s1326_s26  ;;  %p1330_p1 = scmp.lt.u32.totalorder %s1326_s26, %s1746_s8 }
   0x9   :  { %1212 = vmatprep.subr.bf16.mxu0 %v1338_v3  ;;  %v213_v16 = vld [vmem:[%s1741_s3 + $0x8] sm:$0xff]  ;;  %v214_v18 = vld [vmem:[%s1741_s3 + $0x10] sm:$0xff]  ;;  %v215_v19 = vld [vmem:[%s1741_s3 + $0x18] sm:$0xff] }
   0xa   :  { %v1207_v17 = vpack.c.bf16 %v213_v16, %v212_v15  ;;  %v1210_v20 = vpack.c.bf16 %v215_v19, %v214_v18  ;;  %v922_v21 = vld [vmem:[%s1740_s2] ss:$0 sm:$0xff]  ;;  %vm1529_vm9 = vmpackc.low %vm48_vm1, %vm48_vm1  ;;  %p1332_p2 = pnand %p1330_p1, %p1327_p0 }
   0xb   :  { %1046 = vmatmul.mubr.msk.f32.vlgmr.msra.gmra.mrb[0].mxu0 %vm48_vm1, %v30_v8  ;;  %v937_v16 = vld [vmem:[%s1742_s4] ss:$0 sm:$0xff] }
   0xc   :  { %1048 = vmatprep.mubr.msk.f32.mxu0 %vm1339_vm0, %v1340_v6  ;;  %1208 = vmatpush3.bf16.msra.mxu1 %v1207_v17 }
   0xd   :  { %1209 = vmatprep.subr.bf16.mxu1 %v1338_v3 }
   0xf   :  { %1049 = vmatmul.mubr.msk.f32.gmra.mrb[2].mxu0 %vm48_vm1, %v31_v9 }
  0x10   :  { %1051 = vmatprep.mubr.msk.f32.mxu0 %vm1339_vm0, %v1340_v6  ;;  %1211 = vmatpush3.bf16.msra.mxu1 %v1210_v20 }
  0x11   :  { %1242 = vmatprep.subr.bf16.mxu1 %v1338_v3 }
  0x13   :  { %1052 = vmatmul.mubr.msk.f32.gmra.mrb[4].mxu0 %vm48_vm1, %v32_v10 }
  0x14   :  { %1054 = vmatprep.mubr.msk.f32.mxu0 %vm1339_vm0, %v1340_v6 }
  0x17   :  { %1055 = vmatmul.mubr.msk.f32.gmra.mrb[6].mxu0 %vm48_vm1, %v33_v11 }
  0x18   :  { %1057 = vmatprep.mubr.msk.f32.mxu0 %vm1339_vm0, %v1340_v6 }
  0x1b   :  { %1058 = vmatmul.mubr.msk.f32.gmra.mrb[8].mxu0 %vm48_vm1, %v34_v12 }
  0x1c   :  { %1060 = vmatprep.mubr.msk.f32.mxu0 %vm1339_vm0, %v1340_v6 }
  0x1f   :  { %1061 = vmatmul.mubr.msk.f32.gmra.mrb[10].mxu0 %vm48_vm1, %v35_v13 }
  0x20   :  { %1063 = vmatprep.mubr.msk.f32.mxu0 %vm1339_vm0, %v1340_v6 }
  0x23   :  { %1064 = vmatmul.mubr.msk.f32.gmra.mrb[12].mxu0 %vm48_vm1, %v36_v14 }
  0x24   :  { %1109 = vmatprep.mubr.msk.f32.mxu0 %vm1339_vm0, %v1340_v6 }
  0xde   :  { %v136_v22 = vpop.f32.mrb[0].mxu0 }
  0xdf   :  { %v137_v23 = vadd.f32 %v922_v21, %v136_v22  ;;  %v1047_v24 = vpop.f32.mrb[1].mxu0 }
  0xe1   :  { %v177_v25 = vmin.f32 %v137_v23, 0.0  ;;  %vm170_vm2 = vcmp.gt.f32.partialorder %v137_v23, 0.0 }
  0xe2   :  { %v141_v26 = vpop.f32.mrb[2].mxu0 }
  0xe3   :  { %v184_v27 = vmul.f32 1.442695, %v177_v25  ;;  %v142_v28 = vadd.f32 %v922_v21, %v141_v26  ;;  %v1050_v29 = vpop.f32.mrb[3].mxu0 }
  0xe5   :  { %1256 = vpow2.f32 %v184_v27  ;;  %v178_v30 = vmin.f32 %v142_v28, 0.0  ;;  %vm171_vm3 = vcmp.gt.f32.partialorder %v142_v28, 0.0 }
  0xe6   :  { %v146_v31 = vpop.f32.mrb[4].mxu0 }
  0xe7   :  { %v186_v32 = vmul.f32 1.442695, %v178_v30  ;;  %v147_v33 = vadd.f32 %v922_v21, %v146_v31  ;;  %v1053_v34 = vpop.f32.mrb[5].mxu0 }
  0xe9   :  { %1258 = vpow2.f32 %v186_v32  ;;  %v179_v35 = vmin.f32 %v147_v33, 0.0  ;;  %vm172_vm4 = vcmp.gt.f32.partialorder %v147_v33, 0.0 }
  0xea   :  { %v151_v36 = vpop.f32.mrb[6].mxu0 }
  0xeb   :  { %v188_v37 = vmul.f32 1.442695, %v179_v35  ;;  %v152_v38 = vadd.f32 %v922_v21, %v151_v36  ;;  %v1056_v39 = vpop.f32.mrb[7].mxu0 }
  0xed   :  { %1260 = vpow2.f32 %v188_v37  ;;  %v180_v40 = vmin.f32 %v152_v38, 0.0  ;;  %vm173_vm5 = vcmp.gt.f32.partialorder %v152_v38, 0.0 }
  0xee   :  { %v156_v41 = vpop.f32.mrb[8].mxu0 }
  0xef   :  { %v1257_v42 = vpop.eup %1256  ;;  %v190_v43 = vmul.f32 1.442695, %v180_v40  ;;  %v157_v44 = vadd.f32 %v922_v21, %v156_v41  ;;  %v1059_v45 = vpop.f32.mrb[9].mxu0 }
  0xf0   :  { %v930_v46 = vadd.f32 -1.0, %v1257_v42 }
  0xf1   :  { %1262 = vpow2.f32 %v190_v43  ;;  %v181_v47 = vmin.f32 %v157_v44, 0.0  ;;  %vm174_vm6 = vcmp.gt.f32.partialorder %v157_v44, 0.0 }
  0xf2   :  { %v161_v48 = vpop.f32.mrb[10].mxu0  ;;  %v205_v49 = vsel %vm170_vm2, %v137_v23, %v930_v46 }
  0xf3   :  { %v1259_v50 = vpop.eup %1258  ;;  %v192_v51 = vmul.f32 1.442695, %v181_v47  ;;  %v162_v52 = vadd.f32 %v922_v21, %v161_v48  ;;  %v1062_v53 = vpop.f32.mrb[11].mxu0  ;;  %1075 = vmatmul.mubr.msk.f32.vlgmr.msra.gmra.mrb[0].mxu1 %vm48_vm1, %v205_v49 }
  0xf4   :  { %1077 = vmatprep.mubr.msk.f32.mxu1 %vm1339_vm0, %v1340_v6  ;;  %v931_v54 = vadd.f32 -1.0, %v1259_v50 }
  0xf5   :  { %1264 = vpow2.f32 %v192_v51  ;;  %v182_v55 = vmin.f32 %v162_v52, 0.0  ;;  %vm175_vm7 = vcmp.gt.f32.partialorder %v162_v52, 0.0 }
  0xf6   :  { %v166_v56 = vpop.f32.mrb[12].mxu0  ;;  %v206_v57 = vsel %vm171_vm3, %v142_v28, %v931_v54 }
  0xf7   :  { %v1261_v58 = vpop.eup %1260  ;;  %v194_v59 = vmul.f32 1.442695, %v182_v55  ;;  %v167_v60 = vadd.f32 %v922_v21, %v166_v56  ;;  %1078 = vmatmul.mubr.msk.f32.gmra.mrb[2].mxu1 %vm48_vm1, %v206_v57  ;;  %v1065_v61 = vpop.f32.mrb[13].mxu0 }
  0xf8   :  { %1080 = vmatprep.mubr.msk.f32.mxu1 %vm1339_vm0, %v1340_v6  ;;  %v932_v62 = vadd.f32 -1.0, %v1261_v58 }
  0xf9   :  { %1266 = vpow2.f32 %v194_v59  ;;  %v183_v63 = vmin.f32 %v167_v60, 0.0  ;;  %vm176_vm8 = vcmp.gt.f32.partialorder %v167_v60, 0.0 }
  0xfa   :  { %v207_v0 = vsel %vm172_vm4, %v147_v33, %v932_v62 }
  0xfb   :  { %v1263_v1 = vpop.eup %1262  ;;  %v196_v2 = vmul.f32 1.442695, %v183_v63  ;;  %1081 = vmatmul.mubr.msk.f32.gmra.mrb[4].mxu1 %vm48_vm1, %v207_v0 }
  0xfc   :  { %1083 = vmatprep.mubr.msk.f32.mxu1 %vm1339_vm0, %v1340_v6  ;;  %v933_v4 = vadd.f32 -1.0, %v1263_v1 }
  0xfd   :  { %1268 = vpow2.f32 %v196_v2 }
  0xfe   :  { %v208_v5 = vsel %vm173_vm5, %v152_v38, %v933_v4 }
  0xff   :  { %v1265_v7 = vpop.eup %1264  ;;  %1084 = vmatmul.mubr.msk.f32.gmra.mrb[6].mxu1 %vm48_vm1, %v208_v5 }
 0x100   :  { %1086 = vmatprep.mubr.msk.f32.mxu1 %vm1339_vm0, %v1340_v6  ;;  %v934_v8 = vadd.f32 -1.0, %v1265_v7 }
 0x102   :  { %v209_v9 = vsel %vm174_vm6, %v157_v44, %v934_v8 }
 0x103   :  { %v1267_v10 = vpop.eup %1266  ;;  %1087 = vmatmul.mubr.msk.f32.gmra.mrb[8].mxu1 %vm48_vm1, %v209_v9 }
 0x104   :  { %1089 = vmatprep.mubr.msk.f32.mxu1 %vm1339_vm0, %v1340_v6  ;;  %v935_v11 = vadd.f32 -1.0, %v1267_v10 }
 0x106   :  { %v210_v12 = vsel %vm175_vm7, %v162_v52, %v935_v11 }
 0x107   :  { %v1269_v13 = vpop.eup %1268  ;;  %1090 = vmatmul.mubr.msk.f32.gmra.mrb[10].mxu1 %vm48_vm1, %v210_v12 }
 0x108   :  { %1092 = vmatprep.mubr.msk.f32.mxu1 %vm1339_vm0, %v1340_v6  ;;  %v936_v14 = vadd.f32 -1.0, %v1269_v13 }
 0x10a   :  { %v211_v15 = vsel %vm176_vm8, %v167_v60, %v936_v14 }
 0x10b   :  { %1093 = vmatmul.mubr.msk.f32.gmra.mrb[12].mxu1 %vm48_vm1, %v211_v15 }
 0x10c   :  { %1121 = vmatprep.mubr.msk.f32.mxu1 %vm1339_vm0, %v1340_v6 }
 0x1c6   :  { %v310_v17 = vpop.f32.mrb[0].mxu1 }
 0x1c7   :  { %v1490_v18 = vadd.f32 %v937_v16, %v310_v17  ;;  %v1076_v19 = vpop.f32.mrb[1].mxu1 }
 0x1c9   :  { %v344_v20 = vmul.f32 %v1490_v18, %v1490_v18 }
 0x1ca   :  { %v315_v21 = vpop.f32.mrb[2].mxu1 }
 0x1cb   :  { %v1494_v22 = vadd.f32 %v937_v16, %v315_v21  ;;  %v1079_v23 = vpop.f32.mrb[3].mxu1  ;;  %v351_v24 = vsel %vm48_vm1, %v344_v20, 0.0 }
 0x1cc   :  { %352 = vadd.xlane.f32.xlu0 %v351_v24 }
 0x1cd   :  { %v345_v25 = vmul.f32 %v1494_v22, %v1494_v22 }
 0x1ce   :  { %v320_v26 = vpop.f32.mrb[4].mxu1 }
 0x1cf   :  { %v1499_v27 = vadd.f32 %v937_v16, %v320_v26  ;;  %v1082_v28 = vpop.f32.mrb[5].mxu1  ;;  %v354_v29 = vsel %vm48_vm1, %v345_v25, 0.0 }
 0x1d0   :  { %355 = vadd.xlane.f32.xlu0 %v354_v29 }
 0x1d1   :  { %v346_v30 = vmul.f32 %v1499_v27, %v1499_v27 }
 0x1d2   :  { %v325_v31 = vpop.f32.mrb[6].mxu1 }
 0x1d3   :  { %v1504_v32 = vadd.f32 %v937_v16, %v325_v31  ;;  %v1085_v33 = vpop.f32.mrb[7].mxu1  ;;  %v357_v34 = vsel %vm48_vm1, %v346_v30, 0.0  ;;  %v571_v30 = vld [vmem:[%s1744_s6 + $0x8] sm:$0xff] }
 0x1d4   :  { %358 = vadd.xlane.f32.xlu1 %v357_v34  ;;  %v573_v33 = vld [vmem:[%s1744_s6 + $0x18] sm:$0xff] }
 0x1d5   :  { %v347_v35 = vmul.f32 %v1504_v32, %v1504_v32 }
 0x1d6   :  { %v330_v36 = vpop.f32.mrb[8].mxu1 }
 0x1d7   :  { %v1509_v37 = vadd.f32 %v937_v16, %v330_v36  ;;  %v1088_v38 = vpop.f32.mrb[9].mxu1  ;;  %v360_v39 = vsel %vm48_vm1, %v347_v35, 0.0  ;;  %v574_v35 = vld [vmem:[%s1744_s6 + $0x20] sm:$0xff]  ;;  %v575_v36 = vld [vmem:[%s1744_s6 + $0x28] sm:$0xff] }
 0x1d8   :  { %361 = vadd.xlane.f32.xlu1 %v360_v39  ;;  %v576_v38 = vld [vmem:[%s1744_s6 + $0x30] sm:$0xff] }
 0x1d9   :  { %v348_v40 = vmul.f32 %v1509_v37, %v1509_v37 }
 0x1da   :  { %v335_v41 = vpop.f32.mrb[10].mxu1 }
 0x1db   :  { %v1514_v42 = vadd.f32 %v937_v16, %v335_v41  ;;  %v1091_v43 = vpop.f32.mrb[11].mxu1  ;;  %v363_v44 = vsel %vm48_vm1, %v348_v40, 0.0 }
 0x1dc   :  { %364 = vadd.xlane.f32.xlu0 %v363_v44 }
 0x1dd   :  { %v349_v45 = vmul.f32 %v1514_v42, %v1514_v42 }
 0x1de   :  { %v340_v46 = vpop.f32.mrb[12].mxu1 }
 0x1df   :  { %v1519_v47 = vadd.f32 %v937_v16, %v340_v46  ;;  %v1094_v48 = vpop.f32.mrb[13].mxu1  ;;  %v366_v49 = vsel %vm48_vm1, %v349_v45, 0.0 }
 0x1e0   :  { %367 = vadd.xlane.f32.xlu1 %v366_v49 }
 0x1e1   :  { %v350_v50 = vmul.f32 %v1519_v47, %v1519_v47 }
 0x1e3   :  { %v369_v51 = vsel %vm48_vm1, %v350_v50, 0.0 }
 0x1e4   :  { %370 = vadd.xlane.f32.xlu0 %v369_v51 }
 0x259   :  { %v353_v52 = vpop.xlane.xlu0 %352 }
 0x25a   :  { %1270 = vrsqrt.f32 %v353_v52 }
 0x25d   :  { %v356_v53 = vpop.xlane.xlu0 %355 }
 0x25e   :  { %1272 = vrsqrt.f32 %v356_v53  ;;  %v556_v53 = vld [vmem:[%s1743_s5] sm:$0xff] }
 0x261   :  { %v359_v54 = vpop.xlane.xlu1 %358 }
 0x262   :  { %1274 = vrsqrt.f32 %v359_v54 }
 0x264   :  { %v1271_v56 = vpop.eup %1270 }
 0x265   :  { %v362_v55 = vpop.xlane.xlu1 %361  ;;  %v393_v58 = vmul.f32 %v1271_v56, %v1490_v18  ;;  %v379_v14 = vmul.f32 1.25, %v1271_v56 }
 0x266   :  { %1276 = vrsqrt.f32 %v362_v55 }
 0x267   :  { %v386_v17 = vmul.f32 %v379_v14, %v1490_v18 }
 0x268   :  { %v1273_v57 = vpop.eup %1272 }
 0x269   :  { %v394_v59 = vmul.f32 %v1273_v57, %v1494_v22  ;;  %v365_v60 = vpop.xlane.xlu0 %364  ;;  %v380_v20 = vmul.f32 1.25, %v1273_v57 }
 0x26a   :  { %1278 = vrsqrt.f32 %v365_v60  ;;  %v557_v60 = vld [vmem:[%s1743_s5 + $0x8] sm:$0xff] }
 0x26b   :  { %v1213_v62 = vpack.c.bf16 %v394_v59, %v393_v58  ;;  %v387_v18 = vmul.f32 %v380_v20, %v1494_v22 }
 0x26c   :  { %v1275_v0 = vpop.eup %1274 }
 0x26d   :  { %1215 = vmatpush3.bf16.xpose.msk.msra.mxu0 %vm1529_vm9, %v1213_v62  ;;  %1246 = vmatpush3.bf16.xpose.msk.msra.mxu1 %vm1529_vm9, %v1213_v62  ;;  %v368_v63 = vpop.xlane.xlu1 %367  ;;  %v395_v2 = vmul.f32 %v1275_v0, %v1499_v27  ;;  %v381_v24 = vmul.f32 1.25, %v1275_v0  ;;  %v558_v0 = vld [vmem:[%s1743_s5 + $0x10] sm:$0xff] }
 0x26e   :  { %1280 = vrsqrt.f32 %v368_v63  ;;  %1216 = vmatprep.subr.bf16.mxu0 %v1338_v3  ;;  %1243 = vmatprep.subr.bf16.mxu1 %v1338_v3 }
 0x26f   :  { %v388_v26 = vmul.f32 %v381_v24, %v1499_v27  ;;  %v570_v27 = vld [vmem:[%s1744_s6] sm:$0xff] }
 0x270   :  { %v1277_v1 = vpop.eup %1276  ;;  %v1225_v31 = vpack.c.bf16 %v571_v30, %v570_v27 }
 0x271   :  { %v396_v4 = vmul.f32 %v1277_v1, %v1504_v32  ;;  %v371_v5 = vpop.xlane.xlu0 %370  ;;  %v382_v29 = vmul.f32 1.25, %v1277_v1 }
 0x272   :  { %1282 = vrsqrt.f32 %v371_v5  ;;  %v559_v5 = vld [vmem:[%s1743_s5 + $0x18] sm:$0xff] }
 0x273   :  { %v1217_v7 = vpack.c.bf16 %v396_v4, %v395_v2  ;;  %v389_v22 = vmul.f32 %v382_v29, %v1504_v32  ;;  %v572_v32 = vld [vmem:[%s1744_s6 + $0x10] sm:$0xff] }
 0x274   :  { %v1279_v8 = vpop.eup %1278  ;;  %v1228_v34 = vpack.c.bf16 %v573_v33, %v572_v32 }
 0x275   :  { %1219 = vmatpush3.bf16.xpose.msk.msra.mxu0 %vm1529_vm9, %v1217_v7  ;;  %1247 = vmatpush3.bf16.xpose.msk.msra.mxu1 %vm1529_vm9, %v1217_v7  ;;  %v397_v10 = vmul.f32 %v1279_v8, %v1509_v37  ;;  %v383_v15 = vmul.f32 1.25, %v1279_v8 }
 0x276   :  { %1220 = vmatprep.subr.bf16.mxu0 %v1338_v3  ;;  %1244 = vmatprep.subr.bf16.mxu1 %v1338_v3 }
 0x277   :  { %v390_v19 = vmul.f32 %v383_v15, %v1509_v37  ;;  %v1231_v37 = vpack.c.bf16 %v575_v36, %v574_v35  ;;  %v1695_v35 = vld [vmem:[%s1745_s7 + $0x18] sm:$0xff] }
 0x278   :  { %v1281_v9 = vpop.eup %1280  ;;  %vm830_vm14 = vcmp.gt.f32.partialorder %v1695_v35, 0.0 }
 0x279   :  { %v398_v11 = vmul.f32 %v1281_v9, %v1514_v42  ;;  %v384_v21 = vmul.f32 1.25, %v1281_v9 }
 0x27b   :  { %v1221_v12 = vpack.c.bf16 %v398_v11, %v397_v10  ;;  %v391_v23 = vmul.f32 %v384_v21, %v1514_v42  ;;  %v560_v10 = vld [vmem:[%s1743_s5 + $0x20] sm:$0xff] }
 0x27c   :  { %v1283_v13 = vpop.eup %1282 }
 0x27d   :  { %1223 = vmatpush3.bf16.xpose.msk.msra.mxu0 %vm1529_vm9, %v1221_v12  ;;  %1248 = vmatpush3.bf16.xpose.msk.msra.mxu1 %vm1529_vm9, %v1221_v12  ;;  %v399_v16 = vmul.f32 %v1283_v13, %v1519_v47  ;;  %v385_v25 = vmul.f32 1.25, %v1283_v13  ;;  %v561_v13 = vld [vmem:[%s1743_s5 + $0x28] sm:$0xff] }
 0x27e   :  { %1107 = vmatprep.subr.mxu0 %v1340_v6  ;;  %1245 = vmatprep.subr.mxu1 %v1340_v6 }
 0x27f   :  { %v392_v28 = vmul.f32 %v385_v25, %v1519_v47 }
 0x285   :  { %1108 = vmatpush3.xpose.msk.msra.mxu0 %vm48_vm1, %v399_v16  ;;  %1249 = vmatpush3.xpose.msk.msra.mxu1 %vm48_vm1, %v399_v16  ;;  %v562_v16 = vld [vmem:[%s1743_s5 + $0x30] sm:$0xff] }
 0x286   :  { %1233 = vmatprep.subr.bf16.mxu0 %v1338_v3  ;;  %1224 = vmatprep.subr.bf16.mxu1 %v1338_v3 }
 0x288   :  { %1110 = vmatmul.mubr.msk.f32.vlgmr.msra.gmra.mrb[14].mxu0 %vm48_vm1, %v386_v17  ;;  %1122 = vmatmul.mubr.msk.f32.vlgmr.msra.gmra.mrb[14].mxu1 %vm48_vm1, %v390_v19  ;;  %v1677_v19 = vld [vmem:[%s1745_s7] sm:$0xff] }
 0x289   :  { %1112 = vmatprep.mubr.msk.f32.mxu0 %vm1339_vm0, %v1340_v6  ;;  %1124 = vmatprep.mubr.msk.f32.mxu1 %vm1339_vm0, %v1340_v6  ;;  %vm827_vm11 = vcmp.gt.f32.partialorder %v1677_v19, 0.0 }
 0x28a   :  { %1235 = vmatpush3.bf16.msra.mxu0 %v1225_v31  ;;  %1226 = vmatpush3.bf16.msra.mxu1 %v1225_v31 }
 0x28b   :  { %1236 = vmatprep.subr.bf16.mxu0 %v1338_v3  ;;  %1227 = vmatprep.subr.bf16.mxu1 %v1338_v3 }
 0x28c   :  { %1113 = vmatmul.mubr.msk.f32.gmra.mrb[16].mxu0 %vm48_vm1, %v387_v18  ;;  %1125 = vmatmul.mubr.msk.f32.gmra.mrb[16].mxu1 %vm48_vm1, %v391_v23  ;;  %v1683_v23 = vld [vmem:[%s1745_s7 + $0x8] sm:$0xff] }
 0x28d   :  { %1115 = vmatprep.mubr.msk.f32.mxu0 %vm1339_vm0, %v1340_v6  ;;  %1127 = vmatprep.mubr.msk.f32.mxu1 %vm1339_vm0, %v1340_v6  ;;  %vm828_vm12 = vcmp.gt.f32.partialorder %v1683_v23, 0.0 }
 0x28e   :  { %1238 = vmatpush3.bf16.msra.mxu0 %v1228_v34  ;;  %1229 = vmatpush3.bf16.msra.mxu1 %v1228_v34 }
 0x28f   :  { %1239 = vmatprep.subr.bf16.mxu0 %v1338_v3  ;;  %1230 = vmatprep.subr.bf16.mxu1 %v1338_v3 }
 0x290   :  { %1116 = vmatmul.mubr.msk.f32.gmra.mrb[18].mxu0 %vm48_vm1, %v388_v26  ;;  %1128 = vmatmul.mubr.msk.f32.gmra.mrb[18].mxu1 %vm48_vm1, %v392_v28 }
 0x291   :  { %1118 = vmatprep.mubr.msk.f32.mxu0 %vm1339_vm0, %v1340_v6  ;;  %1144 = vmatprep.mubr.msk.f32.mxu1 %vm1339_vm0, %v1340_v6 }
 0x292   :  { %1241 = vmatpush3.bf16.msra.mxu0 %v1231_v37  ;;  %1232 = vmatpush3.bf16.msra.mxu1 %v1231_v37 }
 0x293   :  { %1177 = vmatprep.subr.mxu0 %v1340_v6  ;;  %1142 = vmatprep.subr.mxu1 %v1340_v6 }
 0x294   :  { %1119 = vmatmul.mubr.msk.f32.gmra.mrb[20].mxu0 %vm48_vm1, %v389_v22  ;;  %v1689_v22 = vld [vmem:[%s1745_s7 + $0x10] sm:$0xff]  ;;  %vm883_vm1 = vcmask 56320  }
 0x295   :  { %1179 = vmatprep.mubr.msk.f32.mxu0 %vm1339_vm0, %v1340_v6  ;;  %vm829_vm13 = vcmp.gt.f32.partialorder %v1689_v22, 0.0 }
 0x296   :  { %1178 = vmatpush3.msra.mxu0 %v576_v38  ;;  %1143 = vmatpush3.msra.mxu1 %v576_v38 }
 0x35b   :  { %v508_v39 = vpop.f32.mrb[14].mxu0  ;;  %v528_v40 = vpop.f32.mrb[14].mxu1 }
 0x35c   :  { %v542_v41 = vmul.f32 1.442695, %v508_v39  ;;  %v1111_v42 = vpop.f32.mrb[15].mxu0  ;;  %v1123_v43 = vpop.f32.mrb[15].mxu1  ;;  %v550_v56 = vmul.f32 1.442695, %v528_v40 }
 0x35d   :  { %v1701_v43 = vld [vmem:[%s1745_s7 + $0x20] sm:$0xff] }
 0x35e   :  { %1284 = vpow2.f32 %v542_v41  ;;  %vm831_vm15 = vcmp.gt.f32.partialorder %v1701_v43, 0.0 }
 0x35f   :  { %v513_v3 = vpop.f32.mrb[16].mxu0  ;;  %v533_v44 = vpop.f32.mrb[16].mxu1 }
 0x360   :  { %v544_v45 = vmul.f32 1.442695, %v513_v3  ;;  %v1114_v46 = vpop.f32.mrb[17].mxu0  ;;  %v1126_v47 = vpop.f32.mrb[17].mxu1  ;;  %v552_v62 = vmul.f32 1.442695, %v533_v44 }
 0x362   :  { %1286 = vpow2.f32 %v544_v45 }
 0x363   :  { %v518_v48 = vpop.f32.mrb[18].mxu0  ;;  %v538_v49 = vpop.f32.mrb[18].mxu1 }
 0x364   :  { %v546_v50 = vmul.f32 1.442695, %v518_v48  ;;  %v1117_v51 = vpop.f32.mrb[19].mxu0  ;;  %v1129_v52 = vpop.f32.mrb[19].mxu1  ;;  %v554_v2 = vmul.f32 1.442695, %v538_v49 }
 0x366   :  { %1288 = vpow2.f32 %v546_v50 }
 0x367   :  { %v523_v54 = vpop.f32.mrb[20].mxu0 }
 0x368   :  { %v1285_v55 = vpop.eup %1284  ;;  %v548_v57 = vmul.f32 1.442695, %v523_v54  ;;  %v1120_v58 = vpop.f32.mrb[21].mxu0  ;;  %v1707_v54 = vld [vmem:[%s1745_s7 + $0x28] sm:$0xff] }
 0x369   :  { %v563_v59 = vmul.f32 %v1285_v55, %v556_v53  ;;  %1180 = vmatmul.mubr.msk.f32.vlgmr.msra.gmra.mrb[22].mxu0 %vm577_vm10, %v1285_v55 }
 0x36a   :  { %1290 = vpow2.f32 %v548_v57  ;;  %1182 = vmatprep.mubr.msk.f32.mxu0 %vm1339_vm0, %v1340_v6 }
 0x36b   :  { %1145 = vmatmul.mubr.msk.f32.vlgmr.msra.gmra.mrb[20].mxu1 %vm577_vm10, %v563_v59  ;;  %1292 = vpow2.f32 %v550_v56 }
 0x36c   :  { %v1287_v61 = vpop.eup %1286  ;;  %1147 = vmatprep.mubr.msk.f32.mxu1 %vm1339_vm0, %v1340_v6  ;;  %1294 = vpow2.f32 %v552_v62 }
 0x36d   :  { %1183 = vmatmul.mubr.msk.f32.gmra.mrb[24].mxu0 %vm577_vm10, %v1287_v61  ;;  %v564_v63 = vmul.f32 %v1287_v61, %v557_v60  ;;  %1296 = vpow2.f32 %v554_v2 }
 0x36e   :  { %1185 = vmatprep.mubr.msk.f32.mxu0 %vm1339_vm0, %v1340_v6 }
 0x36f   :  { %1148 = vmatmul.mubr.msk.f32.gmra.mrb[22].mxu1 %vm577_vm10, %v564_v63 }
 0x370   :  { %v1289_v1 = vpop.eup %1288  ;;  %1150 = vmatprep.mubr.msk.f32.mxu1 %vm1339_vm0, %v1340_v6 }
 0x371   :  { %1186 = vmatmul.mubr.msk.f32.gmra.mrb[26].mxu0 %vm577_vm10, %v1289_v1  ;;  %v565_v4 = vmul.f32 %v1289_v1, %v558_v0 }
 0x372   :  { %1188 = vmatprep.mubr.msk.f32.mxu0 %vm1339_vm0, %v1340_v6 }
 0x373   :  { %1151 = vmatmul.mubr.msk.f32.gmra.mrb[24].mxu1 %vm577_vm10, %v565_v4  ;;  %v826_v4 = vld [vmem:[%s1745_s7 + $0x30] sm:$0xff] }
 0x374   :  { %v1291_v7 = vpop.eup %1290  ;;  %1153 = vmatprep.mubr.msk.f32.mxu1 %vm1339_vm0, %v1340_v6  ;;  %vm833_vm2 = vcmp.gt.f32.partialorder %v826_v4, 0.0 }
 0x375   :  { %1189 = vmatmul.mubr.msk.f32.gmra.mrb[28].mxu0 %vm577_vm10, %v1291_v7  ;;  %v566_v8 = vmul.f32 %v1291_v7, %v559_v5  ;;  %v1293_v9 = vpop.eup %1292 }
 0x376   :  { %1191 = vmatprep.mubr.msk.f32.mxu0 %vm1339_vm0, %v1340_v6  ;;  %v567_v11 = vmul.f32 %v1293_v9, %v560_v10  ;;  %v1295_v12 = vpop.eup %1294 }
 0x377   :  { %1154 = vmatmul.mubr.msk.f32.gmra.mrb[26].mxu1 %vm577_vm10, %v566_v8  ;;  %v568_v14 = vmul.f32 %v1295_v12, %v561_v13  ;;  %v1297_v15 = vpop.eup %1296 }
 0x378   :  { %1156 = vmatprep.mubr.msk.f32.mxu1 %vm1339_vm0, %v1340_v6  ;;  %v569_v17 = vmul.f32 %v1297_v15, %v562_v16 }
 0x379   :  { %1192 = vmatmul.mubr.msk.f32.gmra.mrb[30].mxu0 %vm577_vm10, %v1293_v9 }
 0x37a   :  { %1194 = vmatprep.mubr.msk.f32.mxu0 %vm1339_vm0, %v1340_v6 }
 0x37b   :  { %1157 = vmatmul.mubr.msk.f32.gmra.mrb[28].mxu1 %vm577_vm10, %v567_v11 }
 0x37c   :  { %1159 = vmatprep.mubr.msk.f32.mxu1 %vm1339_vm0, %v1340_v6 }
 0x37d   :  { %1195 = vmatmul.mubr.msk.f32.gmra.mrb[32].mxu0 %vm577_vm10, %v1295_v12 }
 0x37e   :  { %1197 = vmatprep.mubr.msk.f32.mxu0 %vm1339_vm0, %v1340_v6 }
 0x37f   :  { %1160 = vmatmul.mubr.msk.f32.gmra.mrb[30].mxu1 %vm577_vm10, %v568_v14 }
 0x380   :  { %1162 = vmatprep.mubr.msk.f32.mxu1 %vm1339_vm0, %v1340_v6  ;;  %vm832_vm0 = vcmp.gt.f32.partialorder %v1707_v54, 0.0 }
 0x381   :  { %1198 = vmatmul.mubr.msk.f32.gmra.mrb[34].mxu0 %vm577_vm10, %v1297_v15 }
 0x383   :  { %1163 = vmatmul.mubr.msk.f32.gmra.mrb[32].mxu1 %vm577_vm10, %v569_v17 }
 0x43c   :  { %v786_v20 = vpop.f32.mrb[22].mxu0 }
 0x43d   :  { %v787_v21 = vadd.f32 1e-08, %v786_v20  ;;  %v1181_v18 = vpop.f32.mrb[23].mxu0 }
 0x43e   :  { %v665_v6 = vpop.f32.mrb[20].mxu1 }
 0x43f   :  { %1298 = vlog2.f32 %v787_v21  ;;  %v834_v24 = vsel %vm827_vm11, %v665_v6, 1.0  ;;  %v1146_v25 = vpop.f32.mrb[21].mxu1 }
 0x440   :  { %1300 = vlog2.f32 %v834_v24  ;;  %v791_v26 = vpop.f32.mrb[24].mxu0 }
 0x441   :  { %v792_v28 = vadd.f32 1e-08, %v791_v26  ;;  %v1184_v29 = vpop.f32.mrb[25].mxu0 }
 0x442   :  { %v670_v27 = vpop.f32.mrb[22].mxu1 }
 0x443   :  { %1302 = vlog2.f32 %v792_v28  ;;  %v835_v30 = vsel %vm828_vm12, %v670_v27, 1.0  ;;  %v1149_v31 = vpop.f32.mrb[23].mxu1 }
 0x444   :  { %1304 = vlog2.f32 %v835_v30  ;;  %v796_v32 = vpop.f32.mrb[26].mxu0 }
 0x445   :  { %v797_v33 = vadd.f32 1e-08, %v796_v32  ;;  %v1187_v34 = vpop.f32.mrb[27].mxu0 }
 0x446   :  { %v675_v36 = vpop.f32.mrb[24].mxu1 }
 0x447   :  { %1306 = vlog2.f32 %v797_v33  ;;  %v836_v37 = vsel %vm829_vm13, %v675_v36, 1.0  ;;  %v1152_v38 = vpop.f32.mrb[25].mxu1 }
 0x448   :  { %1308 = vlog2.f32 %v836_v37  ;;  %v801_v39 = vpop.f32.mrb[28].mxu0 }
 0x449   :  { %v1299_v40 = vpop.eup %1298  ;;  %v802_v41 = vadd.f32 1e-08, %v801_v39  ;;  %v1190_v42 = vpop.f32.mrb[29].mxu0 }
 0x44a   :  { %v1301_v3 = vpop.eup %1300  ;;  %v842_v44 = vmul.f32 0.6931472, %v1299_v40  ;;  %v680_v45 = vpop.f32.mrb[26].mxu1 }
 0x44b   :  { %v856_v46 = vmul.f32 0.6931472, %v1301_v3  ;;  %1310 = vlog2.f32 %v802_v41  ;;  %v837_v47 = vsel %vm830_vm14, %v680_v45, 1.0  ;;  %v1155_v48 = vpop.f32.mrb[27].mxu1 }
 0x44c   :  { %1312 = vlog2.f32 %v837_v47  ;;  %v806_v49 = vpop.f32.mrb[30].mxu0 }
 0x44d   :  { %v1303_v50 = vpop.eup %1302  ;;  %v869_v51 = vsub.f32 %v842_v44, %v856_v46  ;;  %v807_v52 = vadd.f32 1e-08, %v806_v49  ;;  %v1193_v53 = vpop.f32.mrb[31].mxu0 }
 0x44e   :  { %v1305_v55 = vpop.eup %1304  ;;  %v844_v56 = vmul.f32 0.6931472, %v1303_v50  ;;  %v685_v57 = vpop.f32.mrb[28].mxu1 }
 0x44f   :  { %v858_v58 = vmul.f32 0.6931472, %v1305_v55  ;;  %1314 = vlog2.f32 %v807_v52  ;;  %v838_v59 = vsel %vm831_vm15, %v685_v57, 1.0  ;;  %v1158_v60 = vpop.f32.mrb[29].mxu1  ;;  %v876_v63 = vmul.f32 %v869_v51, %v1677_v19 }
 0x450   :  { %1316 = vlog2.f32 %v838_v59  ;;  %v811_v61 = vpop.f32.mrb[32].mxu0 }
 0x451   :  { %v1307_v62 = vpop.eup %1306  ;;  %v870_v0 = vsub.f32 %v844_v56, %v858_v58  ;;  %v812_v1 = vadd.f32 1e-08, %v811_v61  ;;  %v1196_v2 = vpop.f32.mrb[33].mxu0  ;;  %v884_v15 = vsel %vm883_vm1, %v876_v63, 0.0 }
 0x452   :  { %v1309_v5 = vpop.eup %1308  ;;  %v846_v7 = vmul.f32 0.6931472, %v1307_v62  ;;  %v690_v8 = vpop.f32.mrb[30].mxu1 }
 0x453   :  { %v877_v9 = vmul.f32 %v870_v0, %v1683_v23  ;;  %v860_v10 = vmul.f32 0.6931472, %v1309_v5  ;;  %1318 = vlog2.f32 %v812_v1  ;;  %v839_v11 = vsel %vm832_vm0, %v690_v8, 1.0  ;;  %v1161_v12 = vpop.f32.mrb[31].mxu1 }
 0x454   :  { %1320 = vlog2.f32 %v839_v11  ;;  %v816_v13 = vpop.f32.mrb[34].mxu0 }
 0x455   :  { %v1311_v14 = vpop.eup %1310  ;;  %v885_v16 = vsel %vm883_vm1, %v877_v9, 0.0  ;;  %v871_v17 = vsub.f32 %v846_v7, %v860_v10  ;;  %v817_v19 = vadd.f32 1e-08, %v816_v13  ;;  %v1199_v20 = vpop.f32.mrb[35].mxu0 }
 0x456   :  { %v1313_v21 = vpop.eup %1312  ;;  %v886_v18 = vadd.f32 %v885_v16, %v884_v15  ;;  %v848_v6 = vmul.f32 0.6931472, %v1311_v14  ;;  %v695_v24 = vpop.f32.mrb[32].mxu1 }
 0x457   :  { %v878_v23 = vmul.f32 %v871_v17, %v1689_v22  ;;  %v862_v25 = vmul.f32 0.6931472, %v1313_v21  ;;  %1322 = vlog2.f32 %v817_v19  ;;  %v840_v26 = vsel %vm833_vm2, %v695_v24, 1.0  ;;  %v1164_v28 = vpop.f32.mrb[33].mxu1 }
 0x458   :  { %1324 = vlog2.f32 %v840_v26 }
 0x459   :  { %v1315_v29 = vpop.eup %1314  ;;  %v887_v27 = vsel %vm883_vm1, %v878_v23, 0.0  ;;  %v872_v30 = vsub.f32 %v848_v6, %v862_v25 }
 0x45a   :  { %v1317_v31 = vpop.eup %1316  ;;  %v888_v32 = vadd.f32 %v887_v27, %v886_v18  ;;  %v850_v33 = vmul.f32 0.6931472, %v1315_v29 }
 0x45b   :  { %v879_v34 = vmul.f32 %v872_v30, %v1695_v35  ;;  %v864_v36 = vmul.f32 0.6931472, %v1317_v31 }
 0x45d   :  { %v1319_v37 = vpop.eup %1318  ;;  %v889_v38 = vsel %vm883_vm1, %v879_v34, 0.0  ;;  %v873_v39 = vsub.f32 %v850_v33, %v864_v36 }
 0x45e   :  { %v1321_v22 = vpop.eup %1320  ;;  %v890_v40 = vadd.f32 %v889_v38, %v888_v32  ;;  %v852_v41 = vmul.f32 0.6931472, %v1319_v37 }
 0x45f   :  { %v880_v42 = vmul.f32 %v873_v39, %v1701_v43  ;;  %v866_v3 = vmul.f32 0.6931472, %v1321_v22 }
 0x461   :  { %v1323_v44 = vpop.eup %1322  ;;  %v891_v45 = vsel %vm883_vm1, %v880_v42, 0.0  ;;  %v874_v46 = vsub.f32 %v852_v41, %v866_v3 }
 0x462   :  { %v1325_v47 = vpop.eup %1324  ;;  %v854_v48 = vmul.f32 0.6931472, %v1323_v44  ;;  %v892_v49 = vadd.f32 %v891_v45, %v890_v40 }
 0x463   :  { %v881_v35 = vmul.f32 %v874_v46, %v1707_v54  ;;  %v868_v50 = vmul.f32 0.6931472, %v1325_v47 }
 0x465   :  { %v875_v51 = vsub.f32 %v854_v48, %v868_v50  ;;  %v893_v52 = vsel %vm883_vm1, %v881_v35, 0.0 }
 0x466   :  { %v894_v53 = vadd.f32 %v893_v52, %v892_v49 }
 0x467   :  { %v882_v55 = vmul.f32 %v875_v51, %v826_v4 }
 0x469   :  { %v895_v56 = vsel %vm883_vm1, %v882_v55, 0.0 }
 0x46a   :  { %v896_v57 = vadd.f32 %v895_v56, %v894_v53 }
 0x46c   :  { %897 = vadd.xlane.f32.xlu1 %v896_v57 }
 0x4f9   :  { %v898_v43 = vpop.xlane.xlu1 %897 }
 0x4fa   :  { %v899_v58 = vrot.slane %v898_v43, 4 }
 0x4fc   :  { %v900_v59 = vadd.f32 %v899_v58, %v898_v43 }
 0x4fe   :  { %v901_v60 = vrot.slane %v900_v59, 2 }
 0x500   :  { %v902_v61 = vadd.f32 %v901_v60, %v900_v59 }
 0x502   :  { %v903_v62 = vrot.slane %v902_v61, 1 }
 0x504   :  { %v904_v63 = vadd.f32 %v903_v62, %v902_v61 }
 0x506   :  { %1250 = vpush %v904_v63 }
 0x537   :  { %s1251_s7 = spop %1250 }
 0x538   :  { %s906_s24 = smul.f32 0.125, %s1251_s7 }
 0x53a   :  { %908 = sst [smem:[#allocation2]] %s906_s24 }
 0x53b   :  { %1335 = shalt.err (!%p1332_p2)
}
 0x53c   :  { %s1341_s9 = smov [#allocation2]  }
 0x53d   :  { %916 = dma.smem_to_hbm %s1341_s9, 16, %s1746_s8, [#allocation3]  }
 0x53e   :  { %1336 = dma.done.wait [#allocation3], 16  }
 0x53f   :  { %1337 = vsyncadd [#allocation3], 4294967280 }
 0x540   :  { %920 = sfence }
 0x541   :  { %921 = vsyncpa [#allocation3], 1 }

</bundles_post_ra>
